<compile_context>
chip_gen: v6e
topology: v6e:2x2x1
jax: 0.10.0
libtpu: 0.0.40
codegen_flags: <defaults>
</compile_context>

<pallas_src>
import functools

import jax
import jax.numpy as jnp
from jax.experimental import pallas as pl
from jax.experimental.pallas import tpu as pltpu


def _gather_sigmoid_kernel(labels_ref, x_hbm, o_ref, buf, sem):
    """One grid step: gather TILE_N class-selected mask rows and sigmoid them.

    labels_ref : SMEM int32 [N_pad]      (scalar prefetch)
    x_hbm      : HBM  [N_pad, C, HW]     (memory_space=pl.ANY, manual DMA)
    o_ref      : VMEM [TILE_N, HW]       output block (lane-dense)
    buf        : VMEM [TILE_N, HW]       gather landing buffer
    sem        : DMA semaphore [1]
    """
    tile_n = buf.shape[0]
    base = pl.program_id(0) * tile_n

    # Issue TILE_N row-gather DMAs: buf[j, :] <- x[base + j, labels[base + j], :]
    @pl.loop(0, tile_n)
    def _issue(j):
        n = base + j
        lbl = labels_ref[n]
        pltpu.make_async_copy(x_hbm.at[n, lbl], buf.at[j], sem.at[0]).start()

    # Drain: every copy signals the same semaphore with an identical row size,
    # so waiting once per row with a same-shaped descriptor balances it.
    @pl.loop(0, tile_n)
    def _drain(j):
        pltpu.make_async_copy(x_hbm.at[base, 0], buf.at[j], sem.at[0]).wait()

    # Sigmoid over the whole lane-dense slab: exp and the approximate
    # reciprocal both ride the otherwise-idle EUP slot.
    # TODO(synk): on v6e/v7x a bf16 input could skip this f32 upcast; kept for
    # v5e (no bf16 VPU/EUP) and because the kernel is DMA-bound anyway.
    logits = buf[...].astype(jnp.float32)
    prob = pl.reciprocal(1.0 + jnp.exp(-logits), approx=True)
    o_ref[...] = prob.astype(o_ref.dtype)


@functools.partial(jax.jit, static_argnames=("tile_n",))
def mask_post_process(x, labels, *, tile_n=128):
    """x: [N, C, H, W] mask logits, labels: [N] int class ids.

    Returns mask_prob of shape [N, 1, H, W] = sigmoid(x[n, labels[n]])[:, None].
    """
    N, C, H, W = x.shape
    HW = H * W
    labels = labels.astype(jnp.int32)

    # Bucket/pad the mask count to a multiple of tile_n so the compiled kernel
    # depends only on the bucket, not the exact number of detections.
    n_pad = ((N + tile_n - 1) // tile_n) * tile_n
    x_flat = x.reshape(N, C, HW)
    if n_pad != N:
        x_flat = jnp.pad(x_flat, ((0, n_pad - N), (0, 0), (0, 0)))
        labels = jnp.pad(labels, (0, n_pad - N))

    grid_spec = pltpu.PrefetchScalarGridSpec(
        num_scalar_prefetch=1,
        grid=(n_pad // tile_n,),
        in_specs=[
            # x stays in HBM; rows are gathered manually inside the kernel.
            pl.BlockSpec(memory_space=pl.ANY),
        ],
        out_specs=pl.BlockSpec((tile_n, HW), lambda i, lbl: (i, 0)),
        scratch_shapes=[
            pltpu.VMEM((tile_n, HW), x.dtype),
            pltpu.SemaphoreType.DMA((1,)),
        ],
    )

    out = pl.pallas_call(
        _gather_sigmoid_kernel,
        out_shape=jax.ShapeDtypeStruct((n_pad, HW), x.dtype),
        grid_spec=grid_spec,
        compiler_params=pltpu.CompilerParams(
            dimension_semantics=("parallel",),
        ),
    )(labels, x_flat)

    return out[:N].reshape(N, 1, H, W)


def mask_post_processor_forward(x, labels_per_image):
    """Full forward: list-of-images glue around the Pallas kernel.

    x: [N, C, H, W] mask logits for all boxes of all images, concatenated.
    labels_per_image: list of 1-D int arrays, one per image (the 'label' field).

    Returns: list (one per image) of mask_prob tensors [n_i, 1, H, W], matching
    `mask_prob.split(boxes_per_image, dim=0)` in the PyTorch module.
    """
    labels = jnp.concatenate(labels_per_image, axis=0)
    mask_prob = mask_post_process(x, labels)

    boxes_per_image = [int(l.shape[0]) for l in labels_per_image]
    results = []
    start = 0
    for n in boxes_per_image:
        results.append(mask_prob[start:start + n])
        start += n
    return results


if __name__ == "__main__":
    key = jax.random.PRNGKey(0)
    # 2 images, 2 boxes each -> N = 4 masks; C = 8 classes; 16x16 mask logits.
    N, C, H, W = 4, 8, 16, 16
    kx, kl = jax.random.split(key)
    x = jax.random.normal(kx, (N, C, H, W), dtype=jnp.float32)
    labels_img0 = jax.random.randint(kl, (2,), 0, C, dtype=jnp.int32)
    labels_img1 = jnp.array([3, 7], dtype=jnp.int32)

    results = mask_post_processor_forward(x, [labels_img0, labels_img1])
    results = [jax.block_until_ready(r) for r in results]

    # Reference check in plain JAX.
    labels = jnp.concatenate([labels_img0, labels_img1])
    ref = jax.nn.sigmoid(x)[jnp.arange(N), labels][:, None]
    got = jnp.concatenate(results, axis=0)
    assert got.shape == (N, 1, H, W), got.shape
    # Loose tolerance: kernel uses the EUP approximate reciprocal (approx=True).
    assert jnp.allclose(got, ref, atol=1e-2), "mismatch vs reference"

    print("KERNEL_OK")
</pallas_src>

<mosaic_0001>
module attributes {stable_mosaic.version = 11 : i64} {
  func.func @_gather_sigmoid_kernel(%arg0: i32, %arg1: memref<128xi32, #tpu.memory_space<smem>>, %arg2: memref<128x8x256xf32, #tpu.memory_space<any>>, %arg3: memref<128x256xf32, #tpu.memory_space<vmem>>, %arg4: memref<128x256xf32, #tpu.memory_space<vmem>>, %arg5: memref<1x!tpu.dma_semaphore, #tpu.memory_space<semaphore_mem>>) attributes {dimension_semantics = [#tpu.dimension_semantics<parallel>], iteration_bounds = array<i64: 1>, scalar_prefetch = 1 : i64, scratch_operands = 2 : i64, tpu.core_type = #tpu.core_type<tc>, window_params = [{}, {transform_indices = @transform_1, window_bounds = array<i64: 128, 256>}]} {
    %c128_i32 = arith.constant 128 : i32
    %0 = arith.muli %arg0, %c128_i32 : i32
    %c0_i32 = arith.constant 0 : i32
    %c128_i32_0 = arith.constant 128 : i32
    %1 = arith.addi %c0_i32, %c128_i32_0 : i32
    %c1_i32 = arith.constant 1 : i32
    scf.for %arg6 = %c0_i32 to %1 step %c1_i32  : i32 {
      %c1_i32_10 = arith.constant 1 : i32
      %11 = arith.muli %arg6, %c1_i32_10 : i32
      %c0_i32_11 = arith.constant 0 : i32
      %12 = arith.addi %c0_i32_11, %11 : i32
      %13 = arith.addi %0, %12 : i32
      %14 = arith.index_cast %13 : i32 to index
      %15 = memref.load %arg1[%14] : memref<128xi32, #tpu.memory_space<smem>>
      %c0_i32_12 = arith.constant 0 : i32
      %c0_i32_13 = arith.constant 0 : i32
      %16 = tpu.memref_slice %arg2[%13, %15, %c0_i32_13] : memref<128x8x256xf32, #tpu.memory_space<any>> -> memref<1x1x256xf32, #tpu.memory_space<any>>
      %17 = tpu.memref_squeeze %16 : memref<1x1x256xf32, #tpu.memory_space<any>> -> memref<256xf32, #tpu.memory_space<any>>
      %c0_i32_14 = arith.constant 0 : i32
      %18 = tpu.memref_slice %arg4[%12, %c0_i32_14] : memref<128x256xf32, #tpu.memory_space<vmem>> -> memref<1x256xf32, #tpu.memory_space<vmem>>
      %19 = tpu.memref_squeeze %18 : memref<1x256xf32, #tpu.memory_space<vmem>> -> memref<256xf32, #tpu.memory_space<vmem>>
      %20 = tpu.memref_slice %arg5[%c0_i32_12] : memref<1x!tpu.dma_semaphore, #tpu.memory_space<semaphore_mem>> -> memref<1x!tpu.dma_semaphore, #tpu.memory_space<semaphore_mem>>
      %21 = tpu.memref_squeeze %20 : memref<1x!tpu.dma_semaphore, #tpu.memory_space<semaphore_mem>> -> memref<!tpu.dma_semaphore, #tpu.memory_space<semaphore_mem>>
      tpu.enqueue_dma source(%17 : memref<256xf32, #tpu.memory_space<any>>) target(%19 : memref<256xf32, #tpu.memory_space<vmem>>) target_semaphore(%21 : memref<!tpu.dma_semaphore, #tpu.memory_space<semaphore_mem>>)
    }
    %c128_i32_1 = arith.constant 128 : i32
    %c0_i32_2 = arith.constant 0 : i32
    %c128_i32_3 = arith.constant 128 : i32
    %2 = arith.addi %c0_i32_2, %c128_i32_3 : i32
    %c1_i32_4 = arith.constant 1 : i32
    scf.for %arg6 = %c0_i32_2 to %2 step %c1_i32_4  : i32 {
      %c1_i32_10 = arith.constant 1 : i32
      %11 = arith.muli %arg6, %c1_i32_10 : i32
      %c0_i32_11 = arith.constant 0 : i32
      %12 = arith.addi %c0_i32_11, %11 : i32
      %c0_i32_12 = arith.constant 0 : i32
      %c0_i32_13 = arith.constant 0 : i32
      %c0_i32_14 = arith.constant 0 : i32
      %13 = tpu.memref_slice %arg2[%0, %c0_i32_12, %c0_i32_14] : memref<128x8x256xf32, #tpu.memory_space<any>> -> memref<1x1x256xf32, #tpu.memory_space<any>>
      %14 = tpu.memref_squeeze %13 : memref<1x1x256xf32, #tpu.memory_space<any>> -> memref<256xf32, #tpu.memory_space<any>>
      %c0_i32_15 = arith.constant 0 : i32
      %15 = tpu.memref_slice %arg4[%12, %c0_i32_15] : memref<128x256xf32, #tpu.memory_space<vmem>> -> memref<1x256xf32, #tpu.memory_space<vmem>>
      %16 = tpu.memref_squeeze %15 : memref<1x256xf32, #tpu.memory_space<vmem>> -> memref<256xf32, #tpu.memory_space<vmem>>
      %17 = tpu.memref_slice %arg5[%c0_i32_13] : memref<1x!tpu.dma_semaphore, #tpu.memory_space<semaphore_mem>> -> memref<1x!tpu.dma_semaphore, #tpu.memory_space<semaphore_mem>>
      %18 = tpu.memref_squeeze %17 : memref<1x!tpu.dma_semaphore, #tpu.memory_space<semaphore_mem>> -> memref<!tpu.dma_semaphore, #tpu.memory_space<semaphore_mem>>
      tpu.wait_dma2 semaphore(%18 : memref<!tpu.dma_semaphore, #tpu.memory_space<semaphore_mem>>) src(%14 : memref<256xf32, #tpu.memory_space<any>>) dst(%16 : memref<256xf32, #tpu.memory_space<vmem>>)
    }
    %c128_i32_5 = arith.constant 128 : i32
    %c0 = arith.constant 0 : index
    %c0_6 = arith.constant 0 : index
    %3 = vector.load %arg4[%c0, %c0_6] : memref<128x256xf32, #tpu.memory_space<vmem>>, vector<128x256xf32>
    %cst = arith.constant 0.000000e+00 : f32
    %4 = vector.broadcast %cst : f32 to vector<128x256xf32>
    %5 = arith.subf %4, %3 : vector<128x256xf32>
    %6 = math.exp %5 : vector<128x256xf32>
    %cst_7 = arith.constant 1.000000e+00 : f32
    %7 = vector.broadcast %cst_7 : f32 to vector<128x256xf32>
    %8 = arith.addf %7, %6 : vector<128x256xf32>
    %9 = tpu.reciprocal %8 {approx = true} : vector<128x256xf32> -> vector<128x256xf32>
    %c0_8 = arith.constant 0 : index
    %c0_9 = arith.constant 0 : index
    %10 = vector.load %arg3[%c0_8, %c0_9] : memref<128x256xf32, #tpu.memory_space<vmem>>, vector<128x256xf32>
    tpu.vector_store %arg3[%c0_8, %c0_9], %9 {strides = array<i32>} : memref<128x256xf32, #tpu.memory_space<vmem>>, vector<128x256xf32>,
    return
  }
  func.func @transform_1(%arg0: i32, %arg1: memref<128xi32, #tpu.memory_space<smem>>) -> (i32, i32) {
    %c0_i32 = arith.constant 0 : i32
    %c0_i32_0 = arith.constant 0 : i32
    return %arg0, %c0_i32 : i32, i32
  }
}

</mosaic_0001>

<bundles_post_ra>
// kernel: mask_post_process.1
= control target key start
LH: loop header
LB: loop body
LE: loop exit
PB: predicated region body
PF: predicated region fallthrough
CT: control target
= control target key end

     0   :  { %s653_s0 = inlined_call_operand.vmem [shape: s32[128], index: 0, kind: input, shape index: {}]   ;;  %s654_s1 = inlined_call_operand.vmem [shape: f32[128,8,256], index: 1, kind: input, shape index: {}]   ;;  %s655_s2 = inlined_call_operand.vmem [shape: f32[128,256], index: 2, kind: output, shape index: {}]  }
   0x1   :  { %s7_s11 = sshll.u32 %s653_s0, 4  ;;  %s8_s11 = int_to_ptr.vmem [resolvable:$true] %s7_s11 }
   0x2   :  { %s503_s12 = scalar_lea.vmem %s8_s11, 16  ;;  %p508_p1 = scmp.lt.s32.totalorder %s8_s11, %s8_s11 }
   0x3   :  { %p504_p0 = scmp.ne.s32.totalorder %s8_s11, %s503_s12  ;;  %p509_p2 = scmp.lt.s32.totalorder %s503_s12, %s503_s12 }
   0x5   :  { %p510_p3 = por %p509_p2, %p508_p1 }
   0x7   :  { %p511_p4 = pnand %p510_p3, %p504_p0 }
   0x9   :  { %514 = shalt.err (!%p511_p4)  }
   0xa   :  { %s535_s13 = smov [#allocation5]  }
   0xb   :  { %10 = dma.vmem_to_smem %s8_s11, 16, %s535_s13, [#allocation4] }
   0xc   :  { %523 = dma.done.wait [#allocation4], 16 }
   0xd   :  { %524 = vsyncadd [#allocation4], 4294967280 }
   0xe   :  { %12 = sfence }
   0xf   :  { %s527_s14 = smov 0  }
  0x10 LB: > { %s21_s15 = sld [smem:[#allocation5 + %s529_s14]]  ;;  %s29_s16 = sshrl.u32 %s529_s14, 3  ;;  %s529_s14 = sphi %s527_s14, %s19_s14  }
  0x11   : > { %s30_s0 = sand.u32 7, %s529_s14   ;;  %s356_s17 = sshll.u32 %s29_s16, 4 }
  0x12   : > { %s355_s18 = sshll.u32 %s529_s14, 4  ;;  %s32_s19 = sadd.s32 %s356_s17, %s30_s0 }
  0x13   : > { %s33_s28 = scalar_lea.vmem [#allocation2], %s32_s19 }
  0x16   : > { %s22_s20 = sshrl.u32 %s21_s15, 3  ;;  %s23_s21 = sand.u32 7, %s21_s15  }
  0x17   : > { %s354_s22 = sshll.u32 %s22_s20, 4 }
  0x18   : > { %s25_s23 = sadd.s32 %s354_s22, %s23_s21 }
  0x19   : > { %s27_s24 = sadd.s32 %s355_s18, %s25_s23 }
  0x1a   : > { %s28_s27 = scalar_lea.vmem %s654_s1, %s27_s24 }
  0x1b   : > { %v52_v0 = vld [vmem:[%s28_s27] sm:$0x1]  ;;  %v54_v1 = vld [vmem:[%s28_s27 + $0x8] sm:$0x1] }
  0x1c   : > { %53 = vst [vmem:[%s33_s28] sm:$0x1] %v52_v0  ;;  %55 = vst [vmem:[%s33_s28 + $0x8] sm:$0x1] %v54_v1 }
  0x1d   : > { %83 = vsyncadd [#allocation3], 32  ;;  %s19_s14 = sadd.s32 1, %s529_s14  }
  0x1e   : > { %p16_p5 = scmp.ge.s32.totalorder %s19_s14, 128  }
  0x1f   :  { %s531_s29 = smov (%p16_p5), 0  }
  0x20   :  { %18 = sbr.rel (!%p16_p5) target bundleno = 16 (0x10), region = 76 }
  0x25 LB: > { %525 = dma.done.wait [#allocation3], 32  ;;  %s533_s29 = sphi %s531_s29, %s89_s29  }
  0x26   : > { %526 = vsyncadd [#allocation3], 4294967264  ;;  %s89_s29 = sadd.s32 1, %s533_s29  }
  0x27   : > { %p86_p6 = scmp.ge.s32.totalorder %s89_s29, 128  }
  0x28   :  { %v92_v2 = vld [vmem:[#allocation2] sm:$0xff] (%p86_p6)  ;;  %v93_v3 = vld [vmem:[#allocation2 + $0x8] sm:$0xff] (%p86_p6)  ;;  %v94_v4 = vld [vmem:[#allocation2 + $0x10] sm:$0xff] (%p86_p6) }
  0x29   :  { %88 = sbr.rel (!%p86_p6) target bundleno = 37 (0x25), region = 87  ;;  %v124_v5 = vsub.f32 (%p86_p6), 0.0, %v92_v2  ;;  %v125_v6 = vsub.f32 (%p86_p6), 0.0, %v93_v3  ;;  %v126_v7 = vsub.f32 (%p86_p6), 0.0, %v94_v4  ;;  %v95_v8 = vld [vmem:[#allocation2 + $0x18] sm:$0xff] (%p86_p6)  ;;  %v96_v9 = vld [vmem:[#allocation2 + $0x20] sm:$0xff] (%p86_p6) }
  0x2a   :  { %v97_v10 = vld [vmem:[#allocation2 + $0x28] sm:$0xff] (%p86_p6)  ;;  %v127_v11 = vsub.f32 (%p86_p6), 0.0, %v95_v8  ;;  %v128_v12 = vsub.f32 (%p86_p6), 0.0, %v96_v9  ;;  %v98_v14 = vld [vmem:[#allocation2 + $0x30] sm:$0xff] (%p86_p6)  ;;  %v99_v15 = vld [vmem:[#allocation2 + $0x38] sm:$0xff] (%p86_p6) }
  0x2b   :  { %v129_v13 = vsub.f32 (%p86_p6), 0.0, %v97_v10  ;;  %v100_v16 = vld [vmem:[#allocation2 + $0x40] sm:$0xff] (%p86_p6)  ;;  %v156_v17 = vmul.f32 (%p86_p6), 1.442695, %v124_v5  ;;  %v158_v18 = vmul.f32 (%p86_p6), 1.442695, %v125_v6 }
  0x2c   :  { %v160_v19 = vmul.f32 (%p86_p6), 1.442695, %v126_v7  ;;  %v162_v20 = vmul.f32 (%p86_p6), 1.442695, %v127_v11  ;;  %v164_v21 = vmul.f32 (%p86_p6), 1.442695, %v128_v12 }
  0x2d   :  { %375 = vpow2.f32 (%p86_p6), %v156_v17  ;;  %v130_v22 = vsub.f32 (%p86_p6), 0.0, %v98_v14  ;;  %v131_v23 = vsub.f32 (%p86_p6), 0.0, %v99_v15  ;;  %v132_v24 = vsub.f32 (%p86_p6), 0.0, %v100_v16  ;;  %v101_v25 = vld [vmem:[#allocation2 + $0x48] sm:$0xff] (%p86_p6)  ;;  %v102_v26 = vld [vmem:[#allocation2 + $0x50] sm:$0xff] (%p86_p6)  ;;  %v103_v27 = vld [vmem:[#allocation2 + $0x58] sm:$0xff] (%p86_p6) }
  0x2e   :  { %377 = vpow2.f32 %v158_v18  ;;  %v166_v28 = vmul.f32 1.442695, %v129_v13  ;;  %v133_v29 = vsub.f32 0.0, %v101_v25  ;;  %v104_v30 = vld [vmem:[#allocation2 + $0x60] sm:$0xff]  ;;  %v134_v32 = vsub.f32 0.0, %v102_v26  ;;  %v105_v33 = vld [vmem:[#allocation2 + $0x68] sm:$0xff] }
  0x2f   :  { %379 = vpow2.f32 %v160_v19  ;;  %v168_v31 = vmul.f32 1.442695, %v130_v22  ;;  %v170_v34 = vmul.f32 1.442695, %v131_v23  ;;  %v135_v35 = vsub.f32 0.0, %v103_v27  ;;  %v106_v36 = vld [vmem:[#allocation2 + $0x70] sm:$0xff] }
  0x30   :  { %381 = vpow2.f32 %v162_v20  ;;  %v172_v37 = vmul.f32 1.442695, %v132_v24  ;;  %v136_v38 = vsub.f32 0.0, %v104_v30  ;;  %v107_v39 = vld [vmem:[#allocation2 + $0x78] sm:$0xff]  ;;  %v174_v40 = vmul.f32 1.442695, %v133_v29 }
  0x31   :  { %383 = vpow2.f32 %v164_v21  ;;  %v137_v41 = vsub.f32 0.0, %v105_v33  ;;  %v176_v42 = vmul.f32 1.442695, %v134_v32  ;;  %v138_v43 = vsub.f32 0.0, %v106_v36  ;;  %v108_v3 = vld [vmem:[#allocation2 + $0x80] sm:$0xff]  ;;  %v109_v6 = vld [vmem:[#allocation2 + $0x88] sm:$0xff] }
  0x32   :  { %385 = vpow2.f32 %v166_v28  ;;  %v178_v44 = vmul.f32 1.442695, %v135_v35  ;;  %v139_v45 = vsub.f32 0.0, %v107_v39  ;;  %v180_v46 = vmul.f32 1.442695, %v136_v38  ;;  %v110_v9 = vld [vmem:[#allocation2 + $0x90] sm:$0xff] }
  0x33   :  { %387 = vpow2.f32 %v168_v31  ;;  %v182_v47 = vmul.f32 1.442695, %v137_v41  ;;  %v184_v48 = vmul.f32 1.442695, %v138_v43  ;;  %v140_v12 = vsub.f32 0.0, %v108_v3  ;;  %v111_v13 = vld [vmem:[#allocation2 + $0x98] sm:$0xff] }
  0x34   :  { %389 = vpow2.f32 %v170_v34  ;;  %v186_v49 = vmul.f32 1.442695, %v139_v45  ;;  %v141_v16 = vsub.f32 0.0, %v109_v6  ;;  %v112_v17 = vld [vmem:[#allocation2 + $0xa0] sm:$0xff]  ;;  %v142_v20 = vsub.f32 0.0, %v110_v9  ;;  %v113_v21 = vld [vmem:[#allocation2 + $0xa8] sm:$0xff] }
  0x35   :  { %391 = vpow2.f32 %v172_v37  ;;  %v143_v24 = vsub.f32 0.0, %v111_v13  ;;  %v114_v25 = vld [vmem:[#allocation2 + $0xb0] sm:$0xff]  ;;  %v188_v28 = vmul.f32 1.442695, %v140_v12  ;;  %v144_v29 = vsub.f32 0.0, %v112_v17  ;;  %v115_v30 = vld [vmem:[#allocation2 + $0xb8] sm:$0xff] }
  0x36   :  { %393 = vpow2.f32 %v174_v40  ;;  %v190_v33 = vmul.f32 1.442695, %v141_v16  ;;  %v145_v34 = vsub.f32 0.0, %v113_v21  ;;  %v116_v35 = vld [vmem:[#allocation2 + $0xc0] sm:$0xff]  ;;  %v192_v37 = vmul.f32 1.442695, %v142_v20 }
  0x37   :  { %395 = vpow2.f32 %v176_v42  ;;  %v146_v38 = vsub.f32 0.0, %v114_v25  ;;  %v117_v39 = vld [vmem:[#allocation2 + $0xc8] sm:$0xff]  ;;  %v194_v41 = vmul.f32 1.442695, %v143_v24  ;;  %v147_v42 = vsub.f32 0.0, %v115_v30  ;;  %v118_v43 = vld [vmem:[#allocation2 + $0xd0] sm:$0xff] }
  0x38   :  { %397 = vpow2.f32 %v178_v44  ;;  %v196_v45 = vmul.f32 1.442695, %v144_v29 }
  0x39   :  { %399 = vpow2.f32 %v180_v46  ;;  %v148_v46 = vsub.f32 0.0, %v116_v35 }
  0x3a   :  { %v376_v50 = vpop.eup %375  ;;  %401 = vpow2.f32 %v182_v47  ;;  %v119_v47 = vld [vmem:[#allocation2 + $0xd8] sm:$0xff] }
  0x3b   :  { %v378_v51 = vpop.eup %377  ;;  %v220_v52 = vadd.f32 1.0, %v376_v50  ;;  %403 = vpow2.f32 %v184_v48  ;;  %v149_v50 = vsub.f32 0.0, %v117_v39 }
  0x3c   :  { %v380_v53 = vpop.eup %379  ;;  %v221_v54 = vadd.f32 1.0, %v378_v51  ;;  %405 = vpow2.f32 %v186_v49  ;;  %v198_v49 = vmul.f32 1.442695, %v145_v34  ;;  %v120_v51 = vld [vmem:[#allocation2 + $0xe0] sm:$0xff] }
  0x3d   :  { %v382_v55 = vpop.eup %381  ;;  %407 = vrcp.f32 %v220_v52  ;;  %v222_v56 = vadd.f32 1.0, %v380_v53  ;;  %v200_v53 = vmul.f32 1.442695, %v146_v38 }
  0x3e   :  { %v384_v57 = vpop.eup %383  ;;  %409 = vrcp.f32 %v221_v54  ;;  %v223_v58 = vadd.f32 1.0, %v382_v55  ;;  %v150_v54 = vsub.f32 0.0, %v118_v43  ;;  %v121_v55 = vld [vmem:[#allocation2 + $0xe8] sm:$0xff] }
  0x3f   :  { %v386_v59 = vpop.eup %385  ;;  %411 = vrcp.f32 %v222_v56  ;;  %v224_v60 = vadd.f32 1.0, %v384_v57  ;;  %v202_v57 = vmul.f32 1.442695, %v147_v42 }
  0x40   :  { %v388_v61 = vpop.eup %387  ;;  %413 = vrcp.f32 %v223_v58  ;;  %v225_v62 = vadd.f32 1.0, %v386_v59  ;;  %v151_v58 = vsub.f32 0.0, %v119_v47  ;;  %v122_v59 = vld [vmem:[#allocation2 + $0xf0] sm:$0xff] }
  0x41   :  { %v390_v63 = vpop.eup %389  ;;  %415 = vrcp.f32 %v224_v60  ;;  %v226_v0 = vadd.f32 1.0, %v388_v61  ;;  %v204_v61 = vmul.f32 1.442695, %v148_v46 }
  0x42   :  { %v392_v1 = vpop.eup %391  ;;  %417 = vrcp.f32 %v225_v62  ;;  %v227_v2 = vadd.f32 1.0, %v390_v63  ;;  %v152_v62 = vsub.f32 0.0, %v120_v51  ;;  %v123_v63 = vld [vmem:[#allocation2 + $0xf8] sm:$0xff] }
  0x43   :  { %v394_v4 = vpop.eup %393  ;;  %419 = vrcp.f32 %v226_v0  ;;  %v228_v5 = vadd.f32 1.0, %v392_v1  ;;  %v206_v1 = vmul.f32 1.442695, %v149_v50 }
  0x44   :  { %v396_v7 = vpop.eup %395  ;;  %421 = vrcp.f32 %v227_v2  ;;  %v229_v8 = vadd.f32 1.0, %v394_v4  ;;  %v153_v2 = vsub.f32 0.0, %v121_v55  ;;  %v208_v4 = vmul.f32 1.442695, %v150_v54 }
  0x45   :  { %v398_v10 = vpop.eup %397  ;;  %423 = vrcp.f32 %v228_v5  ;;  %v230_v11 = vadd.f32 1.0, %v396_v7  ;;  %v154_v5 = vsub.f32 0.0, %v122_v59  ;;  %v210_v7 = vmul.f32 1.442695, %v151_v58 }
  0x46   :  { %v400_v14 = vpop.eup %399  ;;  %425 = vrcp.f32 %v229_v8  ;;  %v231_v15 = vadd.f32 1.0, %v398_v10  ;;  %v155_v8 = vsub.f32 0.0, %v123_v63  ;;  %v212_v10 = vmul.f32 1.442695, %v152_v62 }
  0x47   :  { %v402_v18 = vpop.eup %401  ;;  %427 = vrcp.f32 %v230_v11  ;;  %v232_v19 = vadd.f32 1.0, %v400_v14  ;;  %v214_v12 = vmul.f32 1.442695, %v153_v2  ;;  %v216_v14 = vmul.f32 1.442695, %v154_v5 }
  0x48   :  { %v404_v22 = vpop.eup %403  ;;  %429 = vrcp.f32 %v231_v15  ;;  %v233_v23 = vadd.f32 1.0, %v402_v18  ;;  %v218_v16 = vmul.f32 1.442695, %v155_v8 }
  0x49   :  { %v406_v26 = vpop.eup %405  ;;  %431 = vrcp.f32 %v232_v19  ;;  %v234_v27 = vadd.f32 1.0, %v404_v22 }
  0x4a   :  { %v408_v31 = vpop.eup %407  ;;  %433 = vrcp.f32 %v233_v23  ;;  %v235_v32 = vadd.f32 1.0, %v406_v26 }
  0x4b   :  { %v410_v36 = vpop.eup %409  ;;  %284 = vst [vmem:[%s655_s2] sm:$0xff] %v408_v31  ;;  %435 = vrcp.f32 %v234_v27 }
  0x4c   :  { %v412_v40 = vpop.eup %411  ;;  %285 = vst [vmem:[%s655_s2 + $0x8] sm:$0xff] %v410_v36  ;;  %437 = vrcp.f32 %v235_v32 }
  0x4d   :  { %v414_v44 = vpop.eup %413  ;;  %286 = vst [vmem:[%s655_s2 + $0x10] sm:$0xff] %v412_v40  ;;  %439 = vpow2.f32 %v188_v28 }
  0x4e   :  { %v416_v48 = vpop.eup %415  ;;  %287 = vst [vmem:[%s655_s2 + $0x18] sm:$0xff] %v414_v44  ;;  %441 = vpow2.f32 %v190_v33 }
  0x4f   :  { %v418_v52 = vpop.eup %417  ;;  %288 = vst [vmem:[%s655_s2 + $0x20] sm:$0xff] %v416_v48  ;;  %443 = vpow2.f32 %v192_v37 }
  0x50   :  { %v420_v56 = vpop.eup %419  ;;  %289 = vst [vmem:[%s655_s2 + $0x28] sm:$0xff] %v418_v52  ;;  %445 = vpow2.f32 %v194_v41 }
  0x51   :  { %v422_v60 = vpop.eup %421  ;;  %290 = vst [vmem:[%s655_s2 + $0x30] sm:$0xff] %v420_v56  ;;  %447 = vpow2.f32 %v196_v45 }
  0x52   :  { %v424_v0 = vpop.eup %423  ;;  %291 = vst [vmem:[%s655_s2 + $0x38] sm:$0xff] %v422_v60  ;;  %449 = vpow2.f32 %v198_v49 }
  0x53   :  { %v426_v3 = vpop.eup %425  ;;  %292 = vst [vmem:[%s655_s2 + $0x40] sm:$0xff] %v424_v0  ;;  %451 = vpow2.f32 %v200_v53 }
  0x54   :  { %v428_v6 = vpop.eup %427  ;;  %293 = vst [vmem:[%s655_s2 + $0x48] sm:$0xff] %v426_v3  ;;  %453 = vpow2.f32 %v202_v57 }
  0x55   :  { %v430_v9 = vpop.eup %429  ;;  %294 = vst [vmem:[%s655_s2 + $0x50] sm:$0xff] %v428_v6  ;;  %455 = vpow2.f32 %v204_v61 }
  0x56   :  { %v432_v11 = vpop.eup %431  ;;  %295 = vst [vmem:[%s655_s2 + $0x58] sm:$0xff] %v430_v9  ;;  %457 = vpow2.f32 %v206_v1 }
  0x57   :  { %v434_v13 = vpop.eup %433  ;;  %296 = vst [vmem:[%s655_s2 + $0x60] sm:$0xff] %v432_v11  ;;  %459 = vpow2.f32 %v208_v4 }
  0x58   :  { %v436_v15 = vpop.eup %435  ;;  %297 = vst [vmem:[%s655_s2 + $0x68] sm:$0xff] %v434_v13  ;;  %461 = vpow2.f32 %v210_v7 }
  0x59   :  { %v438_v17 = vpop.eup %437  ;;  %298 = vst [vmem:[%s655_s2 + $0x70] sm:$0xff] %v436_v15  ;;  %463 = vpow2.f32 %v212_v10 }
  0x5a   :  { %v440_v18 = vpop.eup %439  ;;  %299 = vst [vmem:[%s655_s2 + $0x78] sm:$0xff] %v438_v17  ;;  %465 = vpow2.f32 %v214_v12 }
  0x5b   :  { %v442_v19 = vpop.eup %441  ;;  %v236_v20 = vadd.f32 1.0, %v440_v18  ;;  %467 = vpow2.f32 %v216_v14 }
  0x5c   :  { %v444_v21 = vpop.eup %443  ;;  %v237_v22 = vadd.f32 1.0, %v442_v19  ;;  %469 = vpow2.f32 %v218_v16 }
  0x5d   :  { %v446_v23 = vpop.eup %445  ;;  %471 = vrcp.f32 %v236_v20  ;;  %v238_v24 = vadd.f32 1.0, %v444_v21 }
  0x5e   :  { %v448_v25 = vpop.eup %447  ;;  %473 = vrcp.f32 %v237_v22  ;;  %v239_v26 = vadd.f32 1.0, %v446_v23 }
  0x5f   :  { %v450_v27 = vpop.eup %449  ;;  %475 = vrcp.f32 %v238_v24  ;;  %v240_v28 = vadd.f32 1.0, %v448_v25 }
  0x60   :  { %v452_v29 = vpop.eup %451  ;;  %477 = vrcp.f32 %v239_v26  ;;  %v241_v30 = vadd.f32 1.0, %v450_v27 }
  0x61   :  { %v454_v31 = vpop.eup %453  ;;  %479 = vrcp.f32 %v240_v28  ;;  %v242_v32 = vadd.f32 1.0, %v452_v29 }
  0x62   :  { %v456_v33 = vpop.eup %455  ;;  %481 = vrcp.f32 %v241_v30  ;;  %v243_v34 = vadd.f32 1.0, %v454_v31 }
  0x63   :  { %v458_v35 = vpop.eup %457  ;;  %483 = vrcp.f32 %v242_v32  ;;  %v244_v36 = vadd.f32 1.0, %v456_v33 }
  0x64   :  { %v460_v37 = vpop.eup %459  ;;  %485 = vrcp.f32 %v243_v34  ;;  %v245_v38 = vadd.f32 1.0, %v458_v35 }
  0x65   :  { %v462_v39 = vpop.eup %461  ;;  %487 = vrcp.f32 %v244_v36  ;;  %v246_v40 = vadd.f32 1.0, %v460_v37 }
  0x66   :  { %v464_v41 = vpop.eup %463  ;;  %489 = vrcp.f32 %v245_v38  ;;  %v247_v42 = vadd.f32 1.0, %v462_v39 }
  0x67   :  { %v466_v43 = vpop.eup %465  ;;  %491 = vrcp.f32 %v246_v40  ;;  %v248_v44 = vadd.f32 1.0, %v464_v41 }
  0x68   :  { %v468_v45 = vpop.eup %467  ;;  %493 = vrcp.f32 %v247_v42  ;;  %v249_v46 = vadd.f32 1.0, %v466_v43 }
  0x69   :  { %v470_v47 = vpop.eup %469  ;;  %495 = vrcp.f32 %v248_v44  ;;  %v250_v48 = vadd.f32 1.0, %v468_v45 }
  0x6a   :  { %v472_v49 = vpop.eup %471  ;;  %497 = vrcp.f32 %v249_v46  ;;  %v251_v50 = vadd.f32 1.0, %v470_v47 }
  0x6b   :  { %v474_v51 = vpop.eup %473  ;;  %300 = vst [vmem:[%s655_s2 + $0x80] sm:$0xff] %v472_v49  ;;  %499 = vrcp.f32 %v250_v48 }
  0x6c   :  { %v476_v52 = vpop.eup %475  ;;  %301 = vst [vmem:[%s655_s2 + $0x88] sm:$0xff] %v474_v51  ;;  %501 = vrcp.f32 %v251_v50 }
  0x6d   :  { %v478_v53 = vpop.eup %477  ;;  %302 = vst [vmem:[%s655_s2 + $0x90] sm:$0xff] %v476_v52 }
  0x6e   :  { %v480_v54 = vpop.eup %479  ;;  %303 = vst [vmem:[%s655_s2 + $0x98] sm:$0xff] %v478_v53 }
  0x6f   :  { %v482_v55 = vpop.eup %481  ;;  %304 = vst [vmem:[%s655_s2 + $0xa0] sm:$0xff] %v480_v54 }
  0x70   :  { %v484_v56 = vpop.eup %483  ;;  %305 = vst [vmem:[%s655_s2 + $0xa8] sm:$0xff] %v482_v55 }
  0x71   :  { %v486_v57 = vpop.eup %485  ;;  %306 = vst [vmem:[%s655_s2 + $0xb0] sm:$0xff] %v484_v56 }
  0x72   :  { %v488_v58 = vpop.eup %487  ;;  %307 = vst [vmem:[%s655_s2 + $0xb8] sm:$0xff] %v486_v57 }
  0x73   :  { %v490_v59 = vpop.eup %489  ;;  %308 = vst [vmem:[%s655_s2 + $0xc0] sm:$0xff] %v488_v58 }
  0x74   :  { %v492_v60 = vpop.eup %491  ;;  %309 = vst [vmem:[%s655_s2 + $0xc8] sm:$0xff] %v490_v59 }
  0x75   :  { %v494_v61 = vpop.eup %493  ;;  %310 = vst [vmem:[%s655_s2 + $0xd0] sm:$0xff] %v492_v60 }
  0x76   :  { %v496_v62 = vpop.eup %495  ;;  %311 = vst [vmem:[%s655_s2 + $0xd8] sm:$0xff] %v494_v61 }
  0x77   :  { %v498_v63 = vpop.eup %497  ;;  %312 = vst [vmem:[%s655_s2 + $0xe0] sm:$0xff] %v496_v62 }
  0x78   :  { %v500_v0 = vpop.eup %499  ;;  %313 = vst [vmem:[%s655_s2 + $0xe8] sm:$0xff] %v498_v63 }
  0x79   :  { %v502_v1 = vpop.eup %501  ;;  %314 = vst [vmem:[%s655_s2 + $0xf0] sm:$0xff] %v500_v0 }
  0x7a   :  { %315 = vst [vmem:[%s655_s2 + $0xf8] sm:$0xff] %v502_v1 }
  0x7b   :  { %320 = vsyncmov [#allocation3] }
  0x7e   :  { %s321_s5 = vpop.sfrf %320 }
  0x7f   :  { %p357_p7 = scmp.ne.s32.totalorder %s321_s5, 0 }
  0x81   :  { %325 = shalt.err (%p357_p7)  }

</bundles_post_ra>
